<compile_context>
chip_gen: v6e
topology: v6e:2x2x1
jax: 0.10.0
libtpu: 0.0.40
codegen_flags: <defaults>
</compile_context>

<pallas_src>
import functools

import numpy as np
import jax
import jax.numpy as jnp
from jax.experimental import pallas as pl
from jax.experimental.pallas import tpu as pltpu


def _round_up(x, m):
    return ((x + m - 1) // m) * m


# --------------------------- kernel -----------------------------------------
def _decoder_kernel(feat_ref, w_ref, b_ref, out_ref):
    # (Bt, L) @ (L, N_pad) + (1, N_pad)  ->  (Bt, N_pad)
    out_ref[...] = (
        jnp.dot(feat_ref[...], w_ref[...], preferred_element_type=jnp.float32)
        + b_ref[...]
    )


def _choose_batch_tile(B, L, Np, *, vmem_budget_bytes=24 << 20, max_tile=1024):
    """Pick a batch tile for an HBM-bound single-matmul kernel.

    As large as the VMEM budget allows (big tiles amortize per-grid-step
    overhead), but right-sized to B so the last block wastes little and,
    when B permits, there are >= 2 grid blocks (v7x megacore)."""
    w_bytes = 2 * (L * Np + Np) * 4          # double-buffered weights + bias
    per_row = 2 * (L + Np) * 4               # double-buffered feature + output row
    cap = max(8, ((vmem_budget_bytes - w_bytes) // per_row) // 8 * 8)
    cap = min(cap, max_tile)

    bt = min(cap, _round_up(max(8, pl.cdiv(B, 2)), 8))   # aim for >= 2 blocks
    grid_b = pl.cdiv(B, bt)
    bt = min(cap, _round_up(pl.cdiv(B, grid_b), 8))      # minimize last-block waste
    grid_b = pl.cdiv(B, bt)
    return bt, grid_b


@functools.partial(jax.jit, static_argnames=("input_size",))
def decoder_forward(features, kparams, input_size):
    B, L = features.shape
    W = kparams["w"]           # (L, N_pad), lane-padded to a multiple of 128
    bias = kparams["b"]        # (1, N_pad)
    Np = W.shape[1]
    N = 2 * input_size
    assert Np % 128 == 0 and Np >= N

    Bt, grid_b = _choose_batch_tile(B, L, Np)

    footprint = 2 * Bt * (L + Np) * 4 + 2 * (L * Np + Np) * 4
    vmem_limit = max(16 << 20, min(int(footprint) + (8 << 20), 48 << 20))

    flops = 2 * int(B) * int(L) * int(Np)
    bytes_accessed = 4 * (int(B) * int(L) + int(L) * int(Np) + int(Np)
                          + int(B) * int(Np))

    out = pl.pallas_call(
        _decoder_kernel,
        out_shape=jax.ShapeDtypeStruct((B, Np), jnp.float32),
        grid_spec=pltpu.PrefetchScalarGridSpec(
            num_scalar_prefetch=0,
            grid=(grid_b,),
            in_specs=[
                pl.BlockSpec((Bt, L), lambda i: (i, 0)),   # batch-tiled features
                pl.BlockSpec((L, Np), lambda i: (0, 0)),   # weights resident
                pl.BlockSpec((1, Np), lambda i: (0, 0)),   # bias resident
            ],
            out_specs=pl.BlockSpec((Bt, Np), lambda i: (i, 0)),
        ),
        compiler_params=pltpu.CompilerParams(
            dimension_semantics=("parallel",),
            vmem_limit_bytes=vmem_limit),
        cost_estimate=pl.CostEstimate(
            flops=flops, transcendentals=0, bytes_accessed=bytes_accessed),
    )(features, W, bias)

    # Drop lane padding (inside jit, fuses with the reshape).
    # (B, 2*input_size) row-major == [width0 | width1] -> (B, 1, 2, input_size)
    return out[:, :N].reshape(B, 1, 2, input_size)


# ---------------- deterministic parameter construction (PyTorch shapes) -----
def init_raw_params(key, latent_dim, input_size):
    ks = jax.random.split(key, 10)

    def u(k, shape, fan_in):
        bound = 1.0 / jnp.sqrt(jnp.float32(fan_in))
        return jax.random.uniform(k, shape, jnp.float32, -bound, bound)

    return {
        "w_fc": u(ks[0], (64, latent_dim), latent_dim),      # Linear(latent,64).weight
        "b_fc": u(ks[1], (64,), latent_dim),
        "w_dc": u(ks[2], (64, 32, 1, 5), 64 * 5),            # ConvT(64,32,(1,5)).weight
        "b_dc": u(ks[3], (32,), 64 * 5),
        "w_c1": u(ks[4], (32, 64, 1, 5), 32 * 5),            # ConvT(32,64,(1,5)).weight
        "b_c1": u(ks[5], (64,), 32 * 5),
        "w_c2": u(ks[6], (64, 128, 1, 5), 64 * 5),           # ConvT(64,128,(1,5)).weight
        "b_c2": u(ks[7], (128,), 64 * 5),
        "w_lin": u(ks[8], (input_size, 128), 128),           # Linear(128,input_size).weight
        "b_lin": u(ks[9], (input_size,), 128),
    }


def pack_params(raw):
    """Compose the whole affine decoder into one (L, N_pad) weight + bias.

    Composed host-side in numpy float64 (cast to f32 at the end) to avoid
    accumulation drift vs. the sequential reference.

    Width-2 state is carried as a channel-concatenated slab [x0 | x1].
    ConvTranspose2d(kernel (1,5), pad (0,2), stride 1) with W_in = W_out = 2:
        y0 = x0 @ W[2] + x1 @ W[1] + b
        y1 = x0 @ W[3] + x1 @ W[2] + b
    i.e. [y0|y1] = [x0|x1] @ [[W[2], W[3]], [W[1], W[2]]] + [b|b]
    (taps 0 and 4 are unreachable at W=2, so never materialized).
    The output dim is zero-padded to a multiple of 128 for lane-dense stores.
    """
    f64 = np.float64

    def stage(w, b):
        w = np.asarray(w, dtype=f64)                 # (Cin, Cout, 1, 5)
        b = np.asarray(b, dtype=f64)
        t = [w[:, :, 0, k] for k in range(5)]
        W = np.block([[t[2], t[3]],
                      [t[1], t[2]]])                 # (2*Cin, 2*Cout)
        return W, np.concatenate([b, b])             # (2*Cout,)

    # fc_decoder followed by the 1x1 -> 1x2 bilinear upsample (pure replication).
    wfc_t = np.asarray(raw["w_fc"], dtype=f64).T               # (L, 64)
    M = np.concatenate([wfc_t, wfc_t], axis=1)                 # (L, 128)
    bfc = np.asarray(raw["b_fc"], dtype=f64)
    c = np.concatenate([bfc, bfc])

    # deconv_layer (64->32) [the [:, :, :, :200] slice is a no-op at W=2],
    # conv_final1 (32->64), conv_final2 (64->128).
    for wk, bk in (("w_dc", "b_dc"), ("w_c1", "b_c1"), ("w_c2", "b_c2")):
        Ws, bs = stage(raw[wk], raw[bk])
        M = M @ Ws
        c = c @ Ws + bs

    # squeeze(2) + permute(0,2,1) + linear_final, applied per width position.
    wl = np.asarray(raw["w_lin"], dtype=f64).T                 # (128, out)
    out = wl.shape[1]
    Wl = np.zeros((2 * 128, 2 * out), f64)
    Wl[:128, :out] = wl
    Wl[128:, out:] = wl
    bl_half = np.asarray(raw["b_lin"], dtype=f64)
    bl = np.concatenate([bl_half, bl_half])
    M = M @ Wl
    c = c @ Wl + bl

    # Lane-pad the output dimension to a multiple of 128 (unmasked stores).
    N = 2 * out
    Np = _round_up(N, 128)
    if Np != N:
        M = np.pad(M, ((0, 0), (0, Np - N)))
        c = np.pad(c, (0, Np - N))

    return {"w": jnp.asarray(M, dtype=jnp.float32),
            "b": jnp.asarray(c, dtype=jnp.float32)[None, :]}


# ---------------- pure-JAX reference (independent conv formulation) ---------
def _ref_tconv(x, w, b):
    # x: (B, Cin, 1, W); w: PyTorch ConvTranspose2d weight (Cin, Cout, 1, 5).
    # stride-1 transposed conv == regular conv with flipped kernel, pad k-1-p=2.
    wf = w[:, :, :, ::-1]
    wk = jnp.transpose(wf, (1, 0, 2, 3))  # OIHW
    y = jax.lax.conv_general_dilated(
        x, wk, window_strides=(1, 1), padding=((0, 0), (2, 2)),
        dimension_numbers=("NCHW", "OIHW", "NCHW"))
    return y + b[None, :, None, None]


def ref_forward(features, raw):
    h = features @ raw["w_fc"].T + raw["b_fc"]            # (B, 64)
    x = h[:, :, None, None]                               # (B, 64, 1, 1)
    up = jnp.concatenate([x, x], axis=3)                  # bilinear upsample of 1x1
    x = _ref_tconv(up, raw["w_dc"], raw["b_dc"])[:, :, :, :200]
    x = _ref_tconv(x, raw["w_c1"], raw["b_c1"])
    x = _ref_tconv(x, raw["w_c2"], raw["b_c2"])
    x = x[:, :, 0, :]                                     # squeeze(2) -> (B, 128, 2)
    x = jnp.transpose(x, (0, 2, 1))                       # (B, 2, 128)
    x = x @ raw["w_lin"].T + raw["b_lin"]                 # (B, 2, input_size)
    return x[:, None, :, :]


if __name__ == "__main__":
    B, latent_dim, input_size = 8, 32, 16

    key = jax.random.PRNGKey(0)
    k_feat, k_params = jax.random.split(key)
    features = jax.random.normal(k_feat, (B, latent_dim), jnp.float32)

    raw = init_raw_params(k_params, latent_dim, input_size)
    kparams = pack_params(raw)

    out = decoder_forward(features, kparams, input_size)
    out = jax.block_until_ready(out)

    ref = jax.block_until_ready(ref_forward(features, raw))
    assert out.shape == (B, 1, 2, input_size), out.shape
    assert jnp.allclose(out, ref, atol=1e-4, rtol=1e-4), float(jnp.max(jnp.abs(out - ref)))

    print("KERNEL_OK")
</pallas_src>

<mosaic_0001>
module attributes {stable_mosaic.version = 11 : i64} {
  func.func @_decoder_kernel(%arg0: i32, %arg1: memref<8x32xf32, #tpu.memory_space<vmem>>, %arg2: memref<32x128xf32, #tpu.memory_space<vmem>>, %arg3: memref<1x128xf32, #tpu.memory_space<vmem>>, %arg4: memref<8x128xf32, #tpu.memory_space<vmem>>) attributes {dimension_semantics = [#tpu.dimension_semantics<parallel>], iteration_bounds = array<i64: 1>, scalar_prefetch = 0 : i64, scratch_operands = 0 : i64, tpu.core_type = #tpu.core_type<tc>, window_params = [{transform_indices = @transform_0, window_bounds = array<i64: 8, 32>}, {pipeline_mode = #tpu.pipeline_mode<synchronous>, transform_indices = @transform_1, window_bounds = array<i64: 32, 128>}, {pipeline_mode = #tpu.pipeline_mode<synchronous>, transform_indices = @transform_2, window_bounds = array<i64: 1, 128>}, {transform_indices = @transform_3, window_bounds = array<i64: 8, 128>}]} {
    %c0 = arith.constant 0 : index
    %c0_0 = arith.constant 0 : index
    %0 = vector.load %arg1[%c0, %c0_0] : memref<8x32xf32, #tpu.memory_space<vmem>>, vector<8x32xf32>
    %c0_1 = arith.constant 0 : index
    %c0_2 = arith.constant 0 : index
    %1 = vector.load %arg2[%c0_1, %c0_2] : memref<32x128xf32, #tpu.memory_space<vmem>>, vector<32x128xf32>
    %cst = arith.constant dense<0.000000e+00> : vector<8x128xf32>
    %2 = tpu.matmul %0, %1, %cst {dimension_numbers = #tpu.dot_dimension_numbers<[1], [0], [0], [1], [0, 0, 1, 1], [], []>} : vector<8x32xf32>, vector<32x128xf32>, vector<8x128xf32> -> vector<8x128xf32>
    %c0_3 = arith.constant 0 : index
    %c0_4 = arith.constant 0 : index
    %3 = vector.load %arg3[%c0_3, %c0_4] : memref<1x128xf32, #tpu.memory_space<vmem>>, vector<1x128xf32>
    %4 = vector.broadcast %3 : vector<1x128xf32> to vector<8x128xf32>
    %5 = arith.addf %2, %4 : vector<8x128xf32>
    %c0_5 = arith.constant 0 : index
    %c0_6 = arith.constant 0 : index
    %6 = vector.load %arg4[%c0_5, %c0_6] : memref<8x128xf32, #tpu.memory_space<vmem>>, vector<8x128xf32>
    tpu.vector_store %arg4[%c0_5, %c0_6], %5 {strides = array<i32>} : memref<8x128xf32, #tpu.memory_space<vmem>>, vector<8x128xf32>,
    return
  }
  func.func @transform_0(%arg0: i32) -> (i32, i32) {
    %c0_i32 = arith.constant 0 : i32
    %c0_i32_0 = arith.constant 0 : i32
    return %arg0, %c0_i32 : i32, i32
  }
  func.func @transform_1(%arg0: i32) -> (i32, i32) {
    %c0_i32 = arith.constant 0 : i32
    %c0_i32_0 = arith.constant 0 : i32
    %c0_i32_1 = arith.constant 0 : i32
    return %c0_i32, %c0_i32_0 : i32, i32
  }
  func.func @transform_2(%arg0: i32) -> (i32, i32) {
    %c0_i32 = arith.constant 0 : i32
    %c0_i32_0 = arith.constant 0 : i32
    %c0_i32_1 = arith.constant 0 : i32
    return %c0_i32, %c0_i32_0 : i32, i32
  }
  func.func @transform_3(%arg0: i32) -> (i32, i32) {
    %c0_i32 = arith.constant 0 : i32
    %c0_i32_0 = arith.constant 0 : i32
    return %arg0, %c0_i32 : i32, i32
  }
}

</mosaic_0001>

<bundles_post_ra>
// kernel: decoder_forward.1
= control target key start
LH: loop header
LB: loop body
LE: loop exit
PB: predicated region body
PF: predicated region fallthrough
CT: control target
= control target key end

     0   :  { %8 = vsyncpa [#allocation3], 0  ;;  %s239_s0 = inlined_call_operand.hbm [shape: f32[8,32], index: 0, kind: input, shape index: {}]   ;;  %s240_s1 = inlined_call_operand.hbm [shape: f32[32,128], index: 1, kind: input, shape index: {}]   ;;  %s241_s2 = inlined_call_operand.vmem [shape: f32[1,128], index: 2, kind: input, shape index: {}]   ;;  %s242_s3 = inlined_call_operand.vmem [shape: f32[8,128], index: 3, kind: output, shape index: {}]  }
   0x1   :  { %9 = vsyncpa [#allocation5], 0  ;;  %s201_s12 = smov [#allocation2]   ;;  %s202_s14 = smov [#allocation4]  }
   0x2   :  { %s16_s13 = sshll.u32 %s201_s12, 4  ;;  %s25_s15 = sshll.u32 %s202_s14, 4  ;;  %s17_s13 = int_to_ptr.vmem [resolvable:$true] %s16_s13  ;;  %s26_s15 = int_to_ptr.vmem [resolvable:$true] %s25_s15 }
   0x3   :  { %s165_s16 = scalar_lea.vmem %s17_s13, 128  ;;  %p170_p1 = scmp.lt.s32.totalorder %s17_s13, %s17_s13 }
   0x4   :  { %p166_p0 = scmp.ne.s32.totalorder %s17_s13, %s165_s16  ;;  %p171_p2 = scmp.lt.s32.totalorder %s165_s16, %s165_s16 }
   0x6   :  { %p172_p3 = por %p171_p2, %p170_p1 }
   0x8   :  { %p173_p4 = pnand %p172_p3, %p166_p0 }
   0xa   :  { %176 = shalt.err (!%p173_p4)
}
   0xb   :  { %19 = dma.hbm_to_vmem [thread:$0]  %s239_s0, 128, %s17_s13, [#allocation3]  }
   0xc   :  { %s185_s19 = scalar_lea.vmem %s26_s15, 512  ;;  %p190_p6 = scmp.lt.s32.totalorder %s26_s15, %s26_s15 }
   0xd   :  { %p186_p5 = scmp.ne.s32.totalorder %s26_s15, %s185_s19  ;;  %p191_p7 = scmp.lt.s32.totalorder %s185_s19, %s185_s19 }
   0xf   :  { %p192_p8 = por %p191_p7, %p190_p6 }
  0x11   :  { %p193_p9 = pnand %p192_p8, %p186_p5 }
  0x13   :  { %196 = shalt.err (!%p193_p9)
}
  0x14   :  { %s203_s20 = smov 128   ;;  %s204_s21 = smov 8  }
  0x15   :  { %31 = dma.hbm_to_vmem [thread:$0]  %s240_s1, 512, %s26_s15, [#allocation5], %s203_s20, %s203_s20, %s204_s21  }
  0x16   :  { %197 = dma.done.wait [#allocation3], 128  }
  0x17   :  { %198 = vsyncadd [#allocation3], 4294967168 }
  0x18   :  { %199 = dma.done.wait [#allocation5], 512  }
  0x19   :  { %200 = vsyncadd [#allocation5], 4294966784  ;;  %v205_v0 = vmov 0.0   ;;  %vm206_vm0 = vmmov 0   ;;  %v44_v1 = vld [vmem:[#allocation4 + $0x18] sm:$0xff]  ;;  %v43_v2 = vld [vmem:[#allocation4 + $0x10] sm:$0xff] }
  0x1a   :  { %140 = vmatprep.subr.mxu0 %v205_v0  ;;  %148 = vmatprep.mubr.msk.f32.mxu0 %vm206_vm0, %v205_v0  ;;  %v42_v3 = vld [vmem:[#allocation4 + $0x8] sm:$0xff]  ;;  %v41_v4 = vld [vmem:[#allocation4] sm:$0xff]  ;;  %v40_v5 = vld [vmem:[#allocation2] sm:$0xff]  ;;  %vm52_vm1 = vcmask 261120  }
  0x1b   :  { %141 = vmatpush3.msra.mxu0 %v44_v1  ;;  %v133_v6 = vld [vmem:[%s241_s2] ss:$0 sm:$0xff] }
  0x1c   :  { %142 = vmatprep.subr.mxu0 %v205_v0 }
  0x1d   :  { %143 = vmatpush3.msra.mxu0 %v43_v2 }
  0x1e   :  { %144 = vmatprep.subr.mxu0 %v205_v0 }
  0x1f   :  { %145 = vmatpush3.msra.mxu0 %v42_v3 }
  0x20   :  { %146 = vmatprep.subr.mxu0 %v205_v0 }
  0x21   :  { %147 = vmatpush3.msra.mxu0 %v41_v4 }
  0x22   :  { %149 = vmatmul.mubr.msk.f32.vlgmr.msra.gmra.mxu0 %vm52_vm1, %v40_v5 }
  0xe2   :  { %v122_v7 = vpop.f32.mrf.mxu0 }
  0xe3   :  { %v123_v8 = vadd.f32 %v133_v6, %v122_v7 }
  0xe4   :  { %v150_v9 = vpop.f32.mrf.mxu0 }
  0xe5   :  { %126 = vst [vmem:[%s242_s3] sm:$0xff] %v123_v8 }
  0xe6   :  { %131 = vsyncpa [#allocation3], 1 }
  0xe7   :  { %132 = vsyncpa [#allocation5], 1 }

</bundles_post_ra>
